<compile_context>
chip_gen: v5e
topology: v5e:2x2
jax: 0.10.0
libtpu: 0.0.40
codegen_flags: <defaults>
</compile_context>

<pallas_src>
import functools
import random

import jax
import jax.numpy as jnp
from jax.experimental import pallas as pl
from jax.experimental.pallas import tpu as pltpu


def _round_up(x: int, m: int) -> int:
    return ((x + m - 1) // m) * m


def _make_kernel(n_middle: int):
    """Fused kernel with `n_middle` (Python int) reuses of the middle linear."""

    def kernel(x_ref, w_in_ref, b_in_ref, w_mid_ref, b_mid_ref,
               w_out_ref, b_out_ref, o_ref):
        x = x_ref[...]

        # input_linear + clamp(min=0)
        h = jnp.dot(x, w_in_ref[...], preferred_element_type=jnp.float32)
        h = jnp.maximum(h + b_in_ref[...], 0.0)

        # middle_linear reused n_middle times (unrolled). Loop-invariant
        # weight load and bias broadcast hoisted out of the loop.
        if n_middle > 0:
            w_mid = w_mid_ref[...]
            b_mid = jnp.broadcast_to(b_mid_ref[...], h.shape)
            for _ in range(n_middle):
                h = jnp.dot(h, w_mid, preferred_element_type=jnp.float32)
                h = jnp.maximum(h + b_mid, 0.0)

        # output_linear (no activation); lane-dense (128-wide) f32 store.
        y = jnp.dot(h, w_out_ref[...], preferred_element_type=jnp.float32)
        o_ref[...] = (y + b_out_ref[...]).astype(o_ref.dtype)

    return kernel


@functools.lru_cache(maxsize=None)
def _build_forward(n_middle: int, N: int, D_in: int, H: int, D_out: int):
    """Build (once per shape/n_middle) a jitted padded-forward callable."""
    d_in_p = _round_up(D_in, 128)
    h_p = _round_up(H, 128)
    d_out_p = _round_up(D_out, 128)

    n8 = _round_up(N, 8)
    tm = 512 if n8 >= 512 else n8          # biggest row tile that makes sense
    n_pad = _round_up(N, tm)
    grid = (n_pad // tm,)

    kernel = _make_kernel(n_middle)

    # Streamed (double-buffered) row blocks for x / out; weights stay resident.
    row_block = lambda shape: pl.BlockSpec(shape, lambda i: (i, 0))
    resident = lambda shape: pl.BlockSpec(shape, lambda i: (0, 0))

    # Explicit VMEM budget: 2x double-buffered x/out tiles + resident weights
    # + biases + activation headroom. Capped well under v7x's 64 MiB physical.
    vmem_bytes = 4 * (2 * tm * (d_in_p + d_out_p)
                      + d_in_p * h_p + h_p * h_p + h_p * d_out_p
                      + 2 * h_p + d_out_p
                      + 3 * tm * h_p)
    vmem_limit = int(min(max(2 * vmem_bytes, 16 * 1024 * 1024),
                         48 * 1024 * 1024))

    call = pl.pallas_call(
        kernel,
        out_shape=jax.ShapeDtypeStruct((n_pad, d_out_p), jnp.float32),
        grid_spec=pltpu.PrefetchScalarGridSpec(
            num_scalar_prefetch=0,
            grid=grid,
            in_specs=[
                row_block((tm, d_in_p)),        # x   (streamed rows)
                resident((d_in_p, h_p)),        # w_in
                resident((1, h_p)),             # b_in
                resident((h_p, h_p)),           # w_mid
                resident((1, h_p)),             # b_mid
                resident((h_p, d_out_p)),       # w_out
                resident((1, d_out_p)),         # b_out
            ],
            out_specs=row_block((tm, d_out_p)),
        ),
        compiler_params=pltpu.CompilerParams(
            dimension_semantics=("parallel",),   # shards rows across v7x's 2 TCs
            vmem_limit_bytes=vmem_limit,
        ),
    )

    def fwd(x, pw):
        # Zero-pad activations to (N_pad, D_in_pad); exact (see header note).
        x_p = jnp.zeros((n_pad, d_in_p), jnp.float32).at[:N, :D_in].set(x)
        y_p = call(x_p, pw["w_in"], pw["b_in"], pw["w_mid"], pw["b_mid"],
                   pw["w_out"], pw["b_out"])
        return y_p[:N, :D_out]

    return jax.jit(fwd)


def dynamic_net_forward(x, padded_params, logical_dims, n_middle: int):
    """Run the fused DynamicNet forward pass.

    x:             [N, D_in] float32 (logical, unpadded)
    padded_params: output of pad_params() — weights pre-transposed
                   [in_features_pad, out_features_pad], biases [1, out_pad]
    logical_dims:  (D_in, H, D_out) logical sizes
    n_middle:      number of middle_linear reuses (0..3), baked at trace time
    """
    D_in, H, D_out = logical_dims
    N = x.shape[0]
    fwd = _build_forward(int(n_middle), int(N), int(D_in), int(H), int(D_out))
    return fwd(x, padded_params)


def init_params(key, D_in, H, D_out):
    """nn.Linear-style init U(-1/sqrt(fan_in), 1/sqrt(fan_in)).

    Weights stored pre-transposed as [in_features, out_features] (logical)."""
    ks = jax.random.split(key, 6)

    def lin(kw, kb, fan_in, fan_out):
        bound = 1.0 / jnp.sqrt(jnp.float32(fan_in))
        w = jax.random.uniform(kw, (fan_in, fan_out), jnp.float32, -bound, bound)
        b = jax.random.uniform(kb, (1, fan_out), jnp.float32, -bound, bound)
        return w, b

    w_in, b_in = lin(ks[0], ks[1], D_in, H)
    w_mid, b_mid = lin(ks[2], ks[3], H, H)
    w_out, b_out = lin(ks[4], ks[5], H, D_out)
    return dict(w_in=w_in, b_in=b_in, w_mid=w_mid, b_mid=b_mid,
                w_out=w_out, b_out=b_out)


def pad_params(params, D_in, H, D_out):
    """Zero-pad every feature dim up to 128 lanes (done once, outside the kernel)."""
    d_in_p = _round_up(D_in, 128)
    h_p = _round_up(H, 128)
    d_out_p = _round_up(D_out, 128)

    def pad2(a, rows, cols):
        return (jnp.zeros((rows, cols), jnp.float32)
                .at[:a.shape[0], :a.shape[1]].set(a))

    return dict(
        w_in=pad2(params["w_in"], d_in_p, h_p),
        b_in=pad2(params["b_in"], 1, h_p),
        w_mid=pad2(params["w_mid"], h_p, h_p),
        b_mid=pad2(params["b_mid"], 1, h_p),
        w_out=pad2(params["w_out"], h_p, d_out_p),
        b_out=pad2(params["b_out"], 1, d_out_p),
    )


def reference_forward(x, params, n_middle):
    h = jnp.maximum(x @ params["w_in"] + params["b_in"], 0.0)
    for _ in range(n_middle):
        h = jnp.maximum(h @ params["w_mid"] + params["b_mid"], 0.0)
    return h @ params["w_out"] + params["b_out"]


if __name__ == "__main__":
    # Small shapes consistent with x = torch.randn(N, D_in) and the 3 Linears.
    N, D_in, H, D_out = 8, 16, 32, 8

    key = jax.random.PRNGKey(0)
    kx, kp = jax.random.split(key)
    x = jax.random.normal(kx, (N, D_in), jnp.float32)
    params = init_params(kp, D_in, H, D_out)
    padded = pad_params(params, D_in, H, D_out)   # pad once, reuse every call

    # Exercise (and cache) all 4 possible dynamic graphs, checking each
    # against the pure-JAX reference.
    for nm in range(4):
        y = dynamic_net_forward(x, padded, (D_in, H, D_out), nm)
        jax.block_until_ready(y)
        y_ref = reference_forward(x, params, nm)
        assert y.shape == (N, D_out)
        assert jnp.allclose(y, y_ref, atol=1e-5, rtol=1e-5), f"mismatch nm={nm}"

    # Deterministic stand-in for random.randint(0, 3) in the PyTorch forward;
    # this hits the already-compiled cached kernel (no retrace/recompile).
    random.seed(0)
    n_middle = random.randint(0, 3)
    y = dynamic_net_forward(x, padded, (D_in, H, D_out), n_middle)
    jax.block_until_ready(y)
    assert jnp.allclose(y, reference_forward(x, params, n_middle),
                        atol=1e-5, rtol=1e-5)

    print("KERNEL_OK")
</pallas_src>

<mosaic_0001>
module attributes {stable_mosaic.version = 11 : i64} {
  func.func @kernel(%arg0: i32, %arg1: memref<8x128xf32, #tpu.memory_space<vmem>>, %arg2: memref<128x128xf32, #tpu.memory_space<vmem>>, %arg3: memref<1x128xf32, #tpu.memory_space<vmem>>, %arg4: memref<128x128xf32, #tpu.memory_space<vmem>>, %arg5: memref<1x128xf32, #tpu.memory_space<vmem>>, %arg6: memref<128x128xf32, #tpu.memory_space<vmem>>, %arg7: memref<1x128xf32, #tpu.memory_space<vmem>>, %arg8: memref<8x128xf32, #tpu.memory_space<vmem>>) attributes {dimension_semantics = [#tpu.dimension_semantics<parallel>], iteration_bounds = array<i64: 1>, scalar_prefetch = 0 : i64, scratch_operands = 0 : i64, tpu.core_type = #tpu.core_type<tc>, window_params = [{transform_indices = @transform_0, window_bounds = array<i64: 8, 128>}, {pipeline_mode = #tpu.pipeline_mode<synchronous>, transform_indices = @transform_1, window_bounds = array<i64: 128, 128>}, {pipeline_mode = #tpu.pipeline_mode<synchronous>, transform_indices = @transform_2, window_bounds = array<i64: 1, 128>}, {pipeline_mode = #tpu.pipeline_mode<synchronous>, transform_indices = @transform_3, window_bounds = array<i64: 128, 128>}, {pipeline_mode = #tpu.pipeline_mode<synchronous>, transform_indices = @transform_4, window_bounds = array<i64: 1, 128>}, {pipeline_mode = #tpu.pipeline_mode<synchronous>, transform_indices = @transform_5, window_bounds = array<i64: 128, 128>}, {pipeline_mode = #tpu.pipeline_mode<synchronous>, transform_indices = @transform_6, window_bounds = array<i64: 1, 128>}, {transform_indices = @transform_7, window_bounds = array<i64: 8, 128>}]} {
    %c0 = arith.constant 0 : index
    %c0_0 = arith.constant 0 : index
    %0 = vector.load %arg1[%c0, %c0_0] : memref<8x128xf32, #tpu.memory_space<vmem>>, vector<8x128xf32>
    %c0_1 = arith.constant 0 : index
    %c0_2 = arith.constant 0 : index
    %1 = vector.load %arg2[%c0_1, %c0_2] : memref<128x128xf32, #tpu.memory_space<vmem>>, vector<128x128xf32>
    %cst = arith.constant dense<0.000000e+00> : vector<8x128xf32>
    %2 = tpu.matmul %0, %1, %cst {dimension_numbers = #tpu.dot_dimension_numbers<[1], [0], [0], [1], [0, 0, 1, 1], [], []>} : vector<8x128xf32>, vector<128x128xf32>, vector<8x128xf32> -> vector<8x128xf32>
    %c0_3 = arith.constant 0 : index
    %c0_4 = arith.constant 0 : index
    %3 = vector.load %arg3[%c0_3, %c0_4] : memref<1x128xf32, #tpu.memory_space<vmem>>, vector<1x128xf32>
    %4 = vector.broadcast %3 : vector<1x128xf32> to vector<8x128xf32>
    %5 = arith.addf %2, %4 : vector<8x128xf32>
    %cst_5 = arith.constant 0.000000e+00 : f32
    %6 = vector.broadcast %cst_5 : f32 to vector<8x128xf32>
    %7 = arith.maximumf %5, %6 : vector<8x128xf32>
    %c0_6 = arith.constant 0 : index
    %c0_7 = arith.constant 0 : index
    %8 = vector.load %arg6[%c0_6, %c0_7] : memref<128x128xf32, #tpu.memory_space<vmem>>, vector<128x128xf32>
    %cst_8 = arith.constant dense<0.000000e+00> : vector<8x128xf32>
    %9 = tpu.matmul %7, %8, %cst_8 {dimension_numbers = #tpu.dot_dimension_numbers<[1], [0], [0], [1], [0, 0, 1, 1], [], []>} : vector<8x128xf32>, vector<128x128xf32>, vector<8x128xf32> -> vector<8x128xf32>
    %c0_9 = arith.constant 0 : index
    %c0_10 = arith.constant 0 : index
    %10 = vector.load %arg7[%c0_9, %c0_10] : memref<1x128xf32, #tpu.memory_space<vmem>>, vector<1x128xf32>
    %11 = vector.broadcast %10 : vector<1x128xf32> to vector<8x128xf32>
    %12 = arith.addf %9, %11 : vector<8x128xf32>
    %c0_11 = arith.constant 0 : index
    %c0_12 = arith.constant 0 : index
    %13 = vector.load %arg8[%c0_11, %c0_12] : memref<8x128xf32, #tpu.memory_space<vmem>>, vector<8x128xf32>
    tpu.vector_store %arg8[%c0_11, %c0_12], %12 {strides = array<i32>} : memref<8x128xf32, #tpu.memory_space<vmem>>, vector<8x128xf32>,
    return
  }
  func.func @transform_0(%arg0: i32) -> (i32, i32) {
    %c0_i32 = arith.constant 0 : i32
    %c0_i32_0 = arith.constant 0 : i32
    return %arg0, %c0_i32 : i32, i32
  }
  func.func @transform_1(%arg0: i32) -> (i32, i32) {
    %c0_i32 = arith.constant 0 : i32
    %c0_i32_0 = arith.constant 0 : i32
    %c0_i32_1 = arith.constant 0 : i32
    return %c0_i32, %c0_i32_0 : i32, i32
  }
  func.func @transform_2(%arg0: i32) -> (i32, i32) {
    %c0_i32 = arith.constant 0 : i32
    %c0_i32_0 = arith.constant 0 : i32
    %c0_i32_1 = arith.constant 0 : i32
    return %c0_i32, %c0_i32_0 : i32, i32
  }
  func.func @transform_3(%arg0: i32) -> (i32, i32) {
    %c0_i32 = arith.constant 0 : i32
    %c0_i32_0 = arith.constant 0 : i32
    %c0_i32_1 = arith.constant 0 : i32
    return %c0_i32, %c0_i32_0 : i32, i32
  }
  func.func @transform_4(%arg0: i32) -> (i32, i32) {
    %c0_i32 = arith.constant 0 : i32
    %c0_i32_0 = arith.constant 0 : i32
    %c0_i32_1 = arith.constant 0 : i32
    return %c0_i32, %c0_i32_0 : i32, i32
  }
  func.func @transform_5(%arg0: i32) -> (i32, i32) {
    %c0_i32 = arith.constant 0 : i32
    %c0_i32_0 = arith.constant 0 : i32
    %c0_i32_1 = arith.constant 0 : i32
    return %c0_i32, %c0_i32_0 : i32, i32
  }
  func.func @transform_6(%arg0: i32) -> (i32, i32) {
    %c0_i32 = arith.constant 0 : i32
    %c0_i32_0 = arith.constant 0 : i32
    %c0_i32_1 = arith.constant 0 : i32
    return %c0_i32, %c0_i32_0 : i32, i32
  }
  func.func @transform_7(%arg0: i32) -> (i32, i32) {
    %c0_i32 = arith.constant 0 : i32
    %c0_i32_0 = arith.constant 0 : i32
    return %arg0, %c0_i32 : i32, i32
  }
}

</mosaic_0001>

<bundles_post_ra>
// kernel: fwd.1
= control target key start
LH: loop header
LB: loop body
LE: loop exit
PB: predicated region body
PF: predicated region fallthrough
CT: control target
= control target key end

     0   :  { %12 = vsyncpa [#allocation3], 0  ;;  %s352_s0 = inlined_call_operand.vmem [shape: f32[8,128], index: 0, kind: input, shape index: {}]   ;;  %s353_s1 = inlined_call_operand.hbm [shape: f32[128,128], index: 1, kind: input, shape index: {}]   ;;  %s354_s2 = inlined_call_operand.vmem [shape: f32[1,128], index: 2, kind: input, shape index: {}]   ;;  %s355_s3 = inlined_call_operand.hbm [shape: f32[128,128], index: 3, kind: input, shape index: {}]   ;;  %s356_s4 = inlined_call_operand.vmem [shape: f32[1,128], index: 4, kind: input, shape index: {}]   ;;  %s357_s5 = inlined_call_operand.hbm [shape: f32[128,128], index: 5, kind: input, shape index: {}]   ;;  %s358_s6 = inlined_call_operand.vmem [shape: f32[1,128], index: 6, kind: input, shape index: {}]   ;;  %s359_s7 = inlined_call_operand.hbm [shape: f32[8,128], index: 7, kind: output, shape index: {}]  }
   0x1   :  { %13 = vsyncpa [#allocation6], 0 }
   0x2   :  { %14 = vsyncpa [#allocation4], 0  ;;  %s36_s26 = sshll.u32 %s355_s3, 4  ;;  %s285_s27 = smov [#allocation5]   ;;  %s37_s26 = int_to_ptr.hbm [resolvable:$true] %s36_s26 }
   0x3   :  { %s38_s28 = sshll.u32 %s285_s27, 4  ;;  %s21_s30 = sshll.u32 %s353_s1, 4  ;;  %s39_s28 = int_to_ptr.vmem [resolvable:$true] %s38_s28  ;;  %s22_s30 = int_to_ptr.hbm [resolvable:$true] %s21_s30 }
   0x4   :  { %s286_s8 = smov 128   ;;  %s287_s9 = smov 8  }
   0x5   :  { %44 = dma.hbm_to_vmem [thread:$0]  %s37_s26, 2048, %s39_s28, [#allocation6], %s286_s8, %s286_s8, %s287_s9  }
   0x6   :  { %s288_s10 = smov [#allocation2]   ;;  %s51_s14 = sshll.u32 %s357_s5, 4  ;;  %s52_s14 = int_to_ptr.hbm [resolvable:$true] %s51_s14 }
   0x7   :  { %s23_s11 = sshll.u32 %s288_s10, 4  ;;  %s289_s3 = smov [#allocation7]   ;;  %s24_s11 = int_to_ptr.vmem [resolvable:$true] %s23_s11 }
   0x8   :  { %29 = dma.hbm_to_vmem [thread:$0]  %s22_s30, 2048, %s24_s11, [#allocation3], %s286_s8, %s286_s8, %s287_s9  }
   0x9   :  { %s53_s15 = sshll.u32 %s289_s3, 4  ;;  %s54_s15 = int_to_ptr.vmem [resolvable:$true] %s53_s15 }
   0xa   :  { %59 = dma.hbm_to_vmem [thread:$0]  %s52_s14, 2048, %s54_s15, [#allocation6], %s286_s8, %s286_s8, %s287_s9  }
   0xb   :  { %279 = dma.done.wait [#allocation3], 2048  }
   0xc   :  { %280 = vsyncadd [#allocation3], 4294965248 }
   0xd   :  { %281 = dma.done.wait [#allocation6], 4096  }
   0xe   :  { %282 = vsyncadd [#allocation6], 4294963200  ;;  %v90_v0 = vld [vmem:[#allocation2 + $0x78] sm:$0xff]  ;;  %v89_v1 = vld [vmem:[#allocation2 + $0x70] sm:$0xff]  ;;  %s164_s23 = sshll.u32 %s359_s7, 4  ;;  %s165_s23 = int_to_ptr.hbm [resolvable:$true] %s164_s23 }
   0xf   :  { %95 = vmatpush.msra.mxu0 %v90_v0  ;;  %v88_v2 = vld [vmem:[#allocation2 + $0x68] sm:$0xff]  ;;  %v87_v3 = vld [vmem:[#allocation2 + $0x60] sm:$0xff]  ;;  %v131_v4 = vld [vmem:[#allocation7 + $0x78] sm:$0xff] }
  0x10   :  { %v86_v5 = vld [vmem:[#allocation2 + $0x58] sm:$0xff]  ;;  %136 = vmatpush.msra.mxu1 %v131_v4  ;;  %v130_v6 = vld [vmem:[#allocation7 + $0x70] sm:$0xff]  ;;  %v129_v7 = vld [vmem:[#allocation7 + $0x68] sm:$0xff] }
  0x11   :  { %96 = vmatpush.msra.mxu0 %v89_v1  ;;  %v85_v8 = vld [vmem:[#allocation2 + $0x50] sm:$0xff]  ;;  %v128_v9 = vld [vmem:[#allocation7 + $0x60] sm:$0xff]  ;;  %v84_v10 = vld [vmem:[#allocation2 + $0x48] sm:$0xff] }
  0x12   :  { %137 = vmatpush.msra.mxu1 %v130_v6  ;;  %v127_v11 = vld [vmem:[#allocation7 + $0x58] sm:$0xff]  ;;  %v83_v12 = vld [vmem:[#allocation2 + $0x40] sm:$0xff]  ;;  %v126_v13 = vld [vmem:[#allocation7 + $0x50] sm:$0xff] }
  0x13   :  { %97 = vmatpush.msra.mxu0 %v88_v2  ;;  %v82_v14 = vld [vmem:[#allocation2 + $0x38] sm:$0xff]  ;;  %v125_v15 = vld [vmem:[#allocation7 + $0x48] sm:$0xff]  ;;  %v81_v16 = vld [vmem:[#allocation2 + $0x30] sm:$0xff] }
  0x14   :  { %138 = vmatpush.msra.mxu1 %v129_v7  ;;  %v124_v17 = vld [vmem:[#allocation7 + $0x40] sm:$0xff]  ;;  %v80_v18 = vld [vmem:[#allocation2 + $0x28] sm:$0xff]  ;;  %v123_v19 = vld [vmem:[#allocation7 + $0x38] sm:$0xff] }
  0x15   :  { %98 = vmatpush.msra.mxu0 %v87_v3  ;;  %v79_v20 = vld [vmem:[#allocation2 + $0x20] sm:$0xff]  ;;  %v122_v21 = vld [vmem:[#allocation7 + $0x30] sm:$0xff]  ;;  %v78_v22 = vld [vmem:[#allocation2 + $0x18] sm:$0xff] }
  0x16   :  { %139 = vmatpush.msra.mxu1 %v128_v9  ;;  %v121_v23 = vld [vmem:[#allocation7 + $0x28] sm:$0xff]  ;;  %v77_v24 = vld [vmem:[#allocation2 + $0x10] sm:$0xff]  ;;  %v120_v25 = vld [vmem:[#allocation7 + $0x20] sm:$0xff] }
  0x17   :  { %99 = vmatpush.msra.mxu0 %v86_v5  ;;  %v76_v26 = vld [vmem:[#allocation2 + $0x8] sm:$0xff]  ;;  %v119_v27 = vld [vmem:[#allocation7 + $0x18] sm:$0xff]  ;;  %v75_v28 = vld [vmem:[#allocation2] sm:$0xff] }
  0x18   :  { %140 = vmatpush.msra.mxu1 %v127_v11  ;;  %v74_v29 = vld [vmem:[%s352_s0] sm:$0xff]  ;;  %v118_v30 = vld [vmem:[#allocation7 + $0x10] sm:$0xff]  ;;  %v117_v31 = vld [vmem:[#allocation7 + $0x8] sm:$0xff]  ;;  %s290_s0 = smov [#allocation8]  }
  0x19   :  { %100 = vmatpush.msra.mxu0 %v85_v8  ;;  %v116_v32 = vld [vmem:[#allocation7] sm:$0xff]  ;;  %s162_s20 = sshll.u32 %s290_s0, 4  ;;  %s163_s20 = int_to_ptr.vmem [resolvable:$true] %s162_s20 }
  0x1a   :  { %141 = vmatpush.msra.mxu1 %v126_v13  ;;  %v181_v33 = vld [vmem:[%s354_s2] ss:$0 sm:$0xff] }
  0x1b   :  { %101 = vmatpush.msra.mxu0 %v84_v10  ;;  %v182_v37 = vld [vmem:[%s358_s6] ss:$0 sm:$0xff] }
  0x1c   :  { %142 = vmatpush.msra.mxu1 %v125_v15 }
  0x1d   :  { %102 = vmatpush.msra.mxu0 %v83_v12 }
  0x1e   :  { %143 = vmatpush.msra.mxu1 %v124_v17 }
  0x1f   :  { %103 = vmatpush.msra.mxu0 %v82_v14 }
  0x20   :  { %144 = vmatpush.msra.mxu1 %v123_v19 }
  0x21   :  { %104 = vmatpush.msra.mxu0 %v81_v16 }
  0x22   :  { %145 = vmatpush.msra.mxu1 %v122_v21 }
  0x23   :  { %105 = vmatpush.msra.mxu0 %v80_v18 }
  0x24   :  { %146 = vmatpush.msra.mxu1 %v121_v23 }
  0x25   :  { %106 = vmatpush.msra.mxu0 %v79_v20 }
  0x26   :  { %147 = vmatpush.msra.mxu1 %v120_v25 }
  0x27   :  { %107 = vmatpush.msra.mxu0 %v78_v22 }
  0x28   :  { %148 = vmatpush.msra.mxu1 %v119_v27 }
  0x29   :  { %108 = vmatpush.msra.mxu0 %v77_v24 }
  0x2a   :  { %149 = vmatpush.msra.mxu1 %v118_v30 }
  0x2b   :  { %109 = vmatpush.msra.mxu0 %v76_v26 }
  0x2c   :  { %150 = vmatpush.msra.mxu1 %v117_v31 }
  0x2d   :  { %110 = vmatpush.msra.mxu0 %v75_v28 }
  0x2e   :  { %111 = vmatmul.f32.vlgmr.msra.gmra.mxu0 %v74_v29  ;;  %151 = vmatpush.msra.mxu1 %v116_v32 }
  0xab   :  { %v112_v34 = vpop.f32.mrf.mxu0 }
  0xac   :  { %v113_v35 = vadd.f32 %v181_v33, %v112_v34 }
  0xae   :  { %v115_v36 = vmax.f32 %v113_v35, 0.0 }
  0xb0   :  { %152 = vmatmul.f32.vlgmr.msra.gmra.mxu1 %v115_v36 }
 0x12d   :  { %v153_v38 = vpop.f32.mrf.mxu1 }
 0x12e   :  { %v154_v39 = vadd.f32 %v182_v37, %v153_v38 }
 0x130   :  { %156 = vst [vmem:[#allocation8] sm:$0xff] %v154_v39 }
 0x131   :  { %167 = dma.vmem_to_hbm [thread:$0]  %s163_s20, 128, %s165_s23, [#allocation4]  }
 0x132   :  { %283 = dma.done.wait [#allocation4], 128  }
 0x133   :  { %284 = vsyncadd [#allocation4], 4294967168 }
 0x134   :  { %172 = vsyncpa [#allocation3], 1 }
 0x135   :  { %173 = vsyncpa [#allocation6], 1 }
 0x136   :  { %174 = vsyncpa [#allocation4], 1 }

</bundles_post_ra>
